<compile_context>
chip_gen: v5e
topology: v5e:2x2
jax: 0.10.0
libtpu: 0.0.40
codegen_flags: <defaults>
</compile_context>

<pallas_src>
import functools

import numpy as np
import jax
import jax.numpy as jnp
from jax.experimental import pallas as pl
from jax.experimental.pallas import tpu as pltpu


# ----------------------------- kernel ---------------------------------------

def _make_kernel(b_blk):
    def kernel(x_ref, w_ref, b_ref, interp_t_ref, o_ref):
        # x_ref        : (b_blk, C_in, HW_in)   channels-first, spatially flattened
        # w_ref        : (C_out, C_in)          1x1-conv weight
        # b_ref        : (C_out, 1)             conv bias (broadcast over lanes)
        # interp_t_ref : (HW_in, HW_out)        kron(A_h, A_w)^T bilinear matrix
        # o_ref        : (b_blk, C_out, HW_out) lane-dense output
        w = w_ref[...]
        bias = b_ref[...]
        for b in range(b_blk):                                   # static, small
            y = jnp.dot(w, x_ref[b], preferred_element_type=jnp.float32) + bias
            o_ref[b] = jnp.dot(y, interp_t_ref[...],
                               preferred_element_type=jnp.float32).astype(o_ref.dtype)
    return kernel


# ------------------------ cached host-side constants ------------------------

@functools.lru_cache(maxsize=None)
def _bilinear_matrix(in_size: int, out_size: int) -> np.ndarray:
    """1-D bilinear matrix matching F.interpolate(mode='bilinear', align_corners=False)."""
    scale = in_size / out_size
    i = np.arange(out_size, dtype=np.float64)
    src = (i + 0.5) * scale - 0.5
    src = np.maximum(src, 0.0)                      # PyTorch clamps negative coords to 0
    i0 = np.minimum(np.floor(src).astype(np.int64), in_size - 1)
    i1 = np.minimum(i0 + 1, in_size - 1)
    lam1 = src - i0
    lam0 = 1.0 - lam1
    A = np.zeros((out_size, in_size), dtype=np.float64)
    A[np.arange(out_size), i0] += lam0
    A[np.arange(out_size), i1] += lam1
    return A


@functools.lru_cache(maxsize=None)
def _interp_matrix_t(h_in: int, w_in: int, h_out: int, w_out: int) -> np.ndarray:
    A_h = _bilinear_matrix(h_in, h_out)
    A_w = _bilinear_matrix(w_in, w_out)
    return np.ascontiguousarray(np.kron(A_h, A_w).T.astype(np.float32))  # (HW_in, HW_out)


def _pick_batch_block(n, in_bytes_per_batch, out_bytes_per_batch, budget=4 << 20):
    """Largest divisor of n that keeps >=2 parallel grid steps and a modest VMEM block."""
    per = in_bytes_per_batch + out_bytes_per_batch
    best = 1
    for b in range(1, n + 1):
        if n % b:
            continue
        if n >= 2 and n // b < 2:        # keep >=2 grid steps (v7x has 2 TensorCores)
            continue
        if b * per > budget:
            continue
        best = b
    return best


# ------------------------------ wrapper --------------------------------------

@functools.partial(jax.jit, static_argnums=(3,))
def _feature_adjuster_jit(x_nchw, weight, bias, output_size):
    N, C_in, H_in, W_in = x_nchw.shape
    C_out = weight.shape[0]
    H_out, W_out = output_size
    HW_in, HW_out = H_in * W_in, H_out * W_out

    x_flat = x_nchw.reshape(N, C_in, HW_in).astype(jnp.float32)      # free reshape of NCHW
    w_mat = weight.reshape(C_out, C_in).astype(jnp.float32)
    b_col = bias.reshape(C_out, 1).astype(jnp.float32)
    interp_t = jnp.asarray(_interp_matrix_t(H_in, W_in, H_out, W_out))

    b_blk = _pick_batch_block(N, C_in * HW_in * 4, C_out * HW_out * 4)
    grid = (N // b_blk,)

    # NOTE: loop-invariant operands (w, bias, interp) have constant index maps, so they are
    # DMA'd once; vmem_limit_bytes is left at default since per-step blocks are small here.
    out_flat = pl.pallas_call(
        _make_kernel(b_blk),
        out_shape=jax.ShapeDtypeStruct((N, C_out, HW_out), jnp.float32),
        grid_spec=pltpu.PrefetchScalarGridSpec(
            num_scalar_prefetch=0,
            grid=grid,
            in_specs=[
                pl.BlockSpec((b_blk, C_in, HW_in), lambda n: (n, 0, 0)),
                pl.BlockSpec((C_out, C_in), lambda n: (0, 0)),
                pl.BlockSpec((C_out, 1), lambda n: (0, 0)),
                pl.BlockSpec((HW_in, HW_out), lambda n: (0, 0)),
            ],
            out_specs=pl.BlockSpec((b_blk, C_out, HW_out), lambda n: (n, 0, 0)),
        ),
        compiler_params=pltpu.CompilerParams(dimension_semantics=("parallel",)),
    )(x_flat, w_mat, b_col, interp_t)

    return out_flat.reshape(N, C_out, H_out, W_out)                  # free reshape to NCHW


def feature_adjuster(x_nchw, weight, bias, output_size):
    """x_nchw: (N, C_in, H_in, W_in); weight: (C_out, C_in, 1, 1); bias: (C_out,)."""
    return _feature_adjuster_jit(x_nchw, weight, bias, tuple(int(s) for s in output_size))


# ------------------------------ reference ------------------------------------

def _reference(x_nchw, weight, bias, output_size):
    """Pure-JAX reference (same math, no Pallas) for the correctness check."""
    N, C_in, H_in, W_in = x_nchw.shape
    C_out = weight.shape[0]
    H_out, W_out = output_size
    w = weight.reshape(C_out, C_in)
    hi = jax.lax.Precision.HIGHEST
    y = jnp.einsum("nchw,oc->nohw", x_nchw, w, precision=hi) + bias[None, :, None, None]
    A_h = jnp.asarray(_bilinear_matrix(H_in, H_out), dtype=jnp.float32)
    A_w = jnp.asarray(_bilinear_matrix(W_in, W_out), dtype=jnp.float32)
    return jnp.einsum("ih,nchw,jw->ncij", A_h, y, A_w, precision=hi)


if __name__ == "__main__":
    # Small shapes consistent with the module (channel reduction + 8x8 -> 32x32 upsample).
    N, C_in, C_out = 2, 128, 32
    H_in, W_in = 8, 8
    output_size = (32, 32)

    key = jax.random.PRNGKey(0)
    k_x, k_w, k_b = jax.random.split(key, 3)
    x = jax.random.normal(k_x, (N, C_in, H_in, W_in), dtype=jnp.float32)
    weight = jax.random.normal(k_w, (C_out, C_in, 1, 1), dtype=jnp.float32) * 0.05
    bias = jax.random.normal(k_b, (C_out,), dtype=jnp.float32) * 0.05

    out = jax.block_until_ready(feature_adjuster(x, weight, bias, output_size))
    ref = jax.block_until_ready(_reference(x, weight, bias, output_size))

    assert out.shape == (N, C_out) + output_size, out.shape
    np.testing.assert_allclose(np.asarray(out), np.asarray(ref), rtol=5e-4, atol=5e-4)

    print("KERNEL_OK")
</pallas_src>

<mosaic_0001>
module attributes {stable_mosaic.version = 11 : i64} {
  func.func @kernel(%arg0: i32, %arg1: memref<1x128x64xf32, #tpu.memory_space<vmem>>, %arg2: memref<32x128xf32, #tpu.memory_space<vmem>>, %arg3: memref<32x1xf32, #tpu.memory_space<vmem>>, %arg4: memref<64x1024xf32, #tpu.memory_space<vmem>>, %arg5: memref<1x32x1024xf32, #tpu.memory_space<vmem>>) attributes {dimension_semantics = [#tpu.dimension_semantics<parallel>], iteration_bounds = array<i64: 2>, scalar_prefetch = 0 : i64, scratch_operands = 0 : i64, tpu.core_type = #tpu.core_type<tc>, window_params = [{transform_indices = @transform_0, window_bounds = array<i64: 1, 128, 64>}, {pipeline_mode = #tpu.pipeline_mode<synchronous>, transform_indices = @transform_1, window_bounds = array<i64: 32, 128>}, {pipeline_mode = #tpu.pipeline_mode<synchronous>, transform_indices = @transform_2, window_bounds = array<i64: 32, 1>}, {pipeline_mode = #tpu.pipeline_mode<synchronous>, transform_indices = @transform_3, window_bounds = array<i64: 64, 1024>}, {transform_indices = @transform_4, window_bounds = array<i64: 1, 32, 1024>}]} {
    %c0 = arith.constant 0 : index
    %c0_0 = arith.constant 0 : index
    %0 = vector.load %arg2[%c0, %c0_0] : memref<32x128xf32, #tpu.memory_space<vmem>>, vector<32x128xf32>
    %c0_1 = arith.constant 0 : index
    %c0_2 = arith.constant 0 : index
    %1 = vector.load %arg3[%c0_1, %c0_2] : memref<32x1xf32, #tpu.memory_space<vmem>>, vector<32x1xf32>
    %c0_3 = arith.constant 0 : index
    %c0_4 = arith.constant 0 : index
    %c0_5 = arith.constant 0 : index
    %2 = vector.load %arg1[%c0_3, %c0_4, %c0_5] : memref<1x128x64xf32, #tpu.memory_space<vmem>>, vector<1x128x64xf32>
    %3 = vector.shape_cast %2 : vector<1x128x64xf32> to vector<128x64xf32>
    %cst = arith.constant dense<0.000000e+00> : vector<32x64xf32>
    %4 = tpu.matmul %0, %3, %cst {dimension_numbers = #tpu.dot_dimension_numbers<[1], [0], [0], [1], [0, 0, 1, 1], [], []>} : vector<32x128xf32>, vector<128x64xf32>, vector<32x64xf32> -> vector<32x64xf32>
    %5 = vector.broadcast %1 : vector<32x1xf32> to vector<32x64xf32>
    %6 = arith.addf %4, %5 : vector<32x64xf32>
    %c0_6 = arith.constant 0 : index
    %c0_7 = arith.constant 0 : index
    %7 = vector.load %arg4[%c0_6, %c0_7] : memref<64x1024xf32, #tpu.memory_space<vmem>>, vector<64x1024xf32>
    %cst_8 = arith.constant dense<0.000000e+00> : vector<32x1024xf32>
    %8 = tpu.matmul %6, %7, %cst_8 {dimension_numbers = #tpu.dot_dimension_numbers<[1], [0], [0], [1], [0, 0, 1, 1], [], []>} : vector<32x64xf32>, vector<64x1024xf32>, vector<32x1024xf32> -> vector<32x1024xf32>
    %c0_9 = arith.constant 0 : index
    %c0_10 = arith.constant 0 : index
    %c0_11 = arith.constant 0 : index
    %9 = vector.load %arg5[%c0_9, %c0_10, %c0_11] : memref<1x32x1024xf32, #tpu.memory_space<vmem>>, vector<1x32x1024xf32>
    %10 = vector.shape_cast %9 : vector<1x32x1024xf32> to vector<32x1024xf32>
    %11 = vector.shape_cast %8 : vector<32x1024xf32> to vector<1x32x1024xf32>
    tpu.vector_store %arg5[%c0_9, %c0_10, %c0_11], %11 {strides = array<i32>} : memref<1x32x1024xf32, #tpu.memory_space<vmem>>, vector<1x32x1024xf32>,
    return
  }
  func.func @transform_0(%arg0: i32) -> (i32, i32, i32) {
    %c0_i32 = arith.constant 0 : i32
    %c0_i32_0 = arith.constant 0 : i32
    %c0_i32_1 = arith.constant 0 : i32
    return %arg0, %c0_i32, %c0_i32_0 : i32, i32, i32
  }
  func.func @transform_1(%arg0: i32) -> (i32, i32) {
    %c0_i32 = arith.constant 0 : i32
    %c0_i32_0 = arith.constant 0 : i32
    %c0_i32_1 = arith.constant 0 : i32
    return %c0_i32, %c0_i32_0 : i32, i32
  }
  func.func @transform_2(%arg0: i32) -> (i32, i32) {
    %c0_i32 = arith.constant 0 : i32
    %c0_i32_0 = arith.constant 0 : i32
    %c0_i32_1 = arith.constant 0 : i32
    return %c0_i32, %c0_i32_0 : i32, i32
  }
  func.func @transform_3(%arg0: i32) -> (i32, i32) {
    %c0_i32 = arith.constant 0 : i32
    %c0_i32_0 = arith.constant 0 : i32
    %c0_i32_1 = arith.constant 0 : i32
    return %c0_i32, %c0_i32_0 : i32, i32
  }
  func.func @transform_4(%arg0: i32) -> (i32, i32, i32) {
    %c0_i32 = arith.constant 0 : i32
    %c0_i32_0 = arith.constant 0 : i32
    %c0_i32_1 = arith.constant 0 : i32
    return %arg0, %c0_i32, %c0_i32_0 : i32, i32, i32
  }
}

</mosaic_0001>

<bundles_post_ra>
// kernel: _feature_adjuster_jit.1
= control target key start
LH: loop header
LB: loop body
LE: loop exit
PB: predicated region body
PF: predicated region fallthrough
CT: control target
= control target key end

     0   :  { %9 = vsyncpa [#allocation3], 0  ;;  %s846_s15 = smov 0   ;;  %s988_s0 = inlined_call_operand.vmem [shape: f32[2,128,64], index: 0, kind: input, shape index: {}]   ;;  %s989_s1 = inlined_call_operand.vmem [shape: f32[32,128], index: 1, kind: input, shape index: {}]   ;;  %s990_s2 = inlined_call_operand.vmem [shape: f32[32,1], index: 2, kind: input, shape index: {}]   ;;  %s991_s3 = inlined_call_operand.hbm [shape: f32[64,1024], index: 3, kind: input, shape index: {}]   ;;  %s992_s4 = inlined_call_operand.vmem [shape: f32[2,32,1024], index: 4, kind: output, shape index: {}]  }
   0x1 LB: > { %s152_s18 = sshll.u32 %s991_s3, 4  ;;  %s696_s19 = sadd.s32 4294967295, %s815_s15   ;;  %s815_s15 = sphi %s846_s15, %s15_s15   ;;  %s153_s18 = int_to_ptr.hbm [resolvable:$true] %s152_s18 }
   0x2   : > { %p698_p0 = scmp.ge.s32.totalorder %s815_s15, 1  ;;  %p135_p1 = scmp.lt.s32.totalorder %s815_s15, 3 }
   0x3   : > { %p759_p2 = scmp.eq.s32.totalorder %s696_s19, 0  ;;  %s817_s20 = smov [#allocation2]  }
   0x4   : > { %p136_p3 = pnand %p698_p0, %p135_p1  ;;  %s154_s21 = sshll.u32 %s817_s20, 4  ;;  %s155_s21 = int_to_ptr.vmem [resolvable:$true] %s154_s21 }
   0x5   : > { %s818_s22 = smov 1024   ;;  %s819_s23 = smov 64  }
   0x6   : > { %p755_p4 = pneg %p136_p3  ;;  %178 = sbr.rel (%p136_p3) target bundleno = 398 (0x18e), region = 36 }
   0x8   : > { %p756_p5 = pnand %p759_p2, %p755_p4 }
   0xa   : > { %758 = dma.hbm_to_vmem [thread:$0]  (!%p756_p5), %s153_s18, 8192, %s155_s21, [#allocation3], %s818_s22, %s818_s22, %s819_s23  }
   0xb   : > { %810 = dma.done.wait (%p759_p2), [#allocation3], 8192  }
   0xc   : > { %812 = vsyncadd (%p759_p2), [#allocation3], 4294959104  ;;  %p205_p6 = scmp.lt.s32.totalorder %s696_s19, 1  ;;  %v820_v2 = vmov 0   ;;  %v221_v5 = vld [vmem:[%s990_s2 + $0x10] sm:$0xff]  ;;  %v222_v8 = vld [vmem:[%s990_s2 + $0x18] sm:$0xff] }
   0xd   : > { %773 = vset.pattern.permute.xlu0 %v820_v2  ;;  %774 = vset.pattern.permute.xlu1 %v820_v2  ;;  %v219_v10 = vld [vmem:[%s990_s2] sm:$0xff]  ;;  %v220_v14 = vld [vmem:[%s990_s2 + $0x8] sm:$0xff]  ;;  %v346_v20 = vld [vmem:[#allocation2 + $0x1d0] sm:$0xff]  ;;  %vm352_vm0 = vcmask 523264  }
   0xe   : > { %s994_s19 = smov (!%p205_p6, %s696_s19), 1  ;;  %251 = vperm.xlu0 %773, %v221_v5   ;;  %256 = vperm.xlu1 %774, %v222_v8   ;;  %v344_v19 = vld [vmem:[#allocation2 + $0x1c0] sm:$0xff]  ;;  %v338_v22 = vld [vmem:[#allocation2 + $0x190] sm:$0xff]  ;;  %v216_v31 = vld [vmem:[%s989_s1 + $0x8] sm:$0xff] }
   0xf   : > { %s741_s24 = sshll.u32 %s994_s19, 7  ;;  %373 = vmatpush.msra.mxu1 %v344_v19  ;;  %v336_v21 = vld [vmem:[#allocation2 + $0x180] sm:$0xff]  ;;  %431 = vmatpush.msra.mxu3 %v346_v20  ;;  %v330_v25 = vld [vmem:[#allocation2 + $0x150] sm:$0xff]  ;;  %v218_v33 = vld [vmem:[%s989_s1 + $0x18] sm:$0xff]  ;;  %s742_s20 = sshll.u32 %s994_s19, 8 }
  0x10   : > { %s863_s27 = scalar_lea.vmem %s988_s0, %s741_s24  ;;  %v328_v24 = vld [vmem:[#allocation2 + $0x140] sm:$0xff]  ;;  %743 = vmatpush.msra.mxu2 %v344_v19  ;;  %v350_v28 = vld [vmem:[#allocation2 + $0x1f0] sm:$0xff]  ;;  %v347_v49 = vld [vmem:[#allocation2 + $0x1d8] sm:$0xff]  ;;  %s951_s23 = scalar_lea.vmem %s992_s4, %s742_s20 }
  0x11   : > { %v238_v0 = vld [vmem:[%s863_s27 + $0x78] sm:$0xff]  ;;  %v237_v1 = vld [vmem:[%s863_s27 + $0x70] sm:$0xff]  ;;  %v236_v3 = vld [vmem:[%s863_s27 + $0x68] sm:$0xff]  ;;  %374 = vmatpush.msra.mxu1 %v336_v21  ;;  %432 = vmatpush.msra.mxu3 %v338_v22 }
  0x12   : > { %259 = vmatpush.msra.mxu0 %v238_v0  ;;  %v235_v4 = vld [vmem:[%s863_s27 + $0x60] sm:$0xff]  ;;  %v234_v6 = vld [vmem:[%s863_s27 + $0x58] sm:$0xff]  ;;  %v233_v7 = vld [vmem:[%s863_s27 + $0x50] sm:$0xff]  ;;  %744 = vmatpush.msra.mxu2 %v336_v21 }
  0x13   : > { %v232_v9 = vld [vmem:[%s863_s27 + $0x48] sm:$0xff]  ;;  %v231_v11 = vld [vmem:[%s863_s27 + $0x40] sm:$0xff]  ;;  %v230_v12 = vld [vmem:[%s863_s27 + $0x38] sm:$0xff]  ;;  %375 = vmatpush.msra.mxu1 %v328_v24  ;;  %433 = vmatpush.msra.mxu3 %v330_v25 }
  0x14   : > { %260 = vmatpush.msra.mxu0 %v237_v1  ;;  %v229_v13 = vld [vmem:[%s863_s27 + $0x30] sm:$0xff]  ;;  %v228_v15 = vld [vmem:[%s863_s27 + $0x28] sm:$0xff]  ;;  %v227_v16 = vld [vmem:[%s863_s27 + $0x20] sm:$0xff]  ;;  %745 = vmatpush.msra.mxu2 %v328_v24 }
  0x15   : > { %v226_v17 = vld [vmem:[%s863_s27 + $0x18] sm:$0xff]  ;;  %v225_v18 = vld [vmem:[%s863_s27 + $0x10] sm:$0xff]  ;;  %v224_v23 = vld [vmem:[%s863_s27 + $0x8] sm:$0xff] }
  0x16   : > { %261 = vmatpush.msra.mxu0 %v236_v3  ;;  %241 = vperm.xlu0 %773, %v219_v10   ;;  %v223_v26 = vld [vmem:[%s863_s27] sm:$0xff]  ;;  %v342_v29 = vld [vmem:[#allocation2 + $0x1b0] sm:$0xff]  ;;  %v339_v50 = vld [vmem:[#allocation2 + $0x198] sm:$0xff] }
  0x17   : > { %246 = vperm.xlu1 %774, %v220_v14   ;;  %v215_v27 = vld [vmem:[%s989_s1] sm:$0xff]  ;;  %v334_v30 = vld [vmem:[#allocation2 + $0x170] sm:$0xff]  ;;  %v331_v51 = vld [vmem:[#allocation2 + $0x158] sm:$0xff] }
  0x18   : > { %262 = vmatpush.msra.mxu0 %v235_v4  ;;  %v217_v32 = vld [vmem:[%s989_s1 + $0x10] sm:$0xff]  ;;  %v320_v34 = vld [vmem:[#allocation2 + $0x100] sm:$0xff]  ;;  %v323_v52 = vld [vmem:[#allocation2 + $0x118] sm:$0xff] }
  0x19   : > { %v322_v35 = vld [vmem:[#allocation2 + $0x110] sm:$0xff]  ;;  %376 = vmatpush.msra.mxu1 %v320_v34  ;;  %v312_v37 = vld [vmem:[#allocation2 + $0xc0] sm:$0xff]  ;;  %746 = vmatpush.msra.mxu2 %v320_v34  ;;  %v315_v53 = vld [vmem:[#allocation2 + $0xd8] sm:$0xff] }
  0x1a   : > { %263 = vmatpush.msra.mxu0 %v234_v6  ;;  %v326_v36 = vld [vmem:[#allocation2 + $0x130] sm:$0xff]  ;;  %434 = vmatpush.msra.mxu3 %v322_v35  ;;  %v304_v40 = vld [vmem:[#allocation2 + $0x80] sm:$0xff]  ;;  %v307_v54 = vld [vmem:[#allocation2 + $0x98] sm:$0xff] }
  0x1b   : > { %v314_v38 = vld [vmem:[#allocation2 + $0xd0] sm:$0xff]  ;;  %377 = vmatpush.msra.mxu1 %v312_v37  ;;  %v296_v43 = vld [vmem:[#allocation2 + $0x40] sm:$0xff]  ;;  %747 = vmatpush.msra.mxu2 %v312_v37  ;;  %v299_v55 = vld [vmem:[#allocation2 + $0x58] sm:$0xff] }
  0x1c   : > { %264 = vmatpush.msra.mxu0 %v233_v7  ;;  %v318_v39 = vld [vmem:[#allocation2 + $0xf0] sm:$0xff]  ;;  %435 = vmatpush.msra.mxu3 %v314_v38  ;;  %v288_v46 = vld [vmem:[#allocation2] sm:$0xff]  ;;  %v291_v56 = vld [vmem:[#allocation2 + $0x18] sm:$0xff] }
  0x1d   : > { %v306_v41 = vld [vmem:[#allocation2 + $0x90] sm:$0xff]  ;;  %378 = vmatpush.msra.mxu1 %v304_v40  ;;  %748 = vmatpush.msra.mxu2 %v304_v40  ;;  %v345_v57 = vld [vmem:[#allocation2 + $0x1c8] sm:$0xff]  ;;  %v351_v14 = vld [vmem:[#allocation2 + $0x1f8] sm:$0xff] }
  0x1e   : > { %265 = vmatpush.msra.mxu0 %v232_v9  ;;  %v310_v42 = vld [vmem:[#allocation2 + $0xb0] sm:$0xff]  ;;  %436 = vmatpush.msra.mxu3 %v306_v41  ;;  %v349_v59 = vld [vmem:[#allocation2 + $0x1e8] sm:$0xff]  ;;  %v327_v20 = vld [vmem:[#allocation2 + $0x138] sm:$0xff] }
  0x1f   : > { %v298_v44 = vld [vmem:[#allocation2 + $0x50] sm:$0xff]  ;;  %379 = vmatpush.msra.mxu1 %v296_v43  ;;  %749 = vmatpush.msra.mxu2 %v296_v43  ;;  %v337_v60 = vld [vmem:[#allocation2 + $0x188] sm:$0xff]  ;;  %v319_v21 = vld [vmem:[#allocation2 + $0xf8] sm:$0xff] }
  0x20   : > { %266 = vmatpush.msra.mxu0 %v231_v11  ;;  %v302_v45 = vld [vmem:[#allocation2 + $0x70] sm:$0xff]  ;;  %437 = vmatpush.msra.mxu3 %v298_v44  ;;  %v341_v61 = vld [vmem:[#allocation2 + $0x1a8] sm:$0xff]  ;;  %v311_v22 = vld [vmem:[#allocation2 + $0xb8] sm:$0xff] }
  0x21   : > { %v290_v47 = vld [vmem:[#allocation2 + $0x10] sm:$0xff]  ;;  %380 = vmatpush.msra.mxu1 %v288_v46  ;;  %750 = vmatpush.msra.mxu2 %v288_v46  ;;  %v329_v62 = vld [vmem:[#allocation2 + $0x148] sm:$0xff]  ;;  %v308_v34 = vld [vmem:[#allocation2 + $0xa0] sm:$0xff] }
  0x22   : > { %267 = vmatpush.msra.mxu0 %v230_v12  ;;  %v294_v48 = vld [vmem:[#allocation2 + $0x30] sm:$0xff]  ;;  %438 = vmatpush.msra.mxu3 %v290_v47  ;;  %v333_v63 = vld [vmem:[#allocation2 + $0x168] sm:$0xff]  ;;  %v300_v35 = vld [vmem:[#allocation2 + $0x60] sm:$0xff] }
  0x23   : > { %460 = vmatpush.msrb.mxu1 %v347_v49  ;;  %402 = vmatpush.msrb.mxu2 %v345_v57  ;;  %v321_v0 = vld [vmem:[#allocation2 + $0x108] sm:$0xff] }
  0x24   : > { %268 = vmatpush.msra.mxu0 %v229_v13  ;;  %518 = vmatpush.msrb.mxu3 %v349_v59  ;;  %v325_v1 = vld [vmem:[#allocation2 + $0x128] sm:$0xff] }
  0x25   : > { %461 = vmatpush.msrb.mxu1 %v339_v50  ;;  %403 = vmatpush.msrb.mxu2 %v337_v60  ;;  %v313_v2 = vld [vmem:[#allocation2 + $0xc8] sm:$0xff] }
  0x26   : > { %269 = vmatpush.msra.mxu0 %v228_v15  ;;  %519 = vmatpush.msrb.mxu3 %v341_v61  ;;  %v317_v4 = vld [vmem:[#allocation2 + $0xe8] sm:$0xff]  ;;  %v343_v15 = vld [vmem:[#allocation2 + $0x1b8] sm:$0xff] }
  0x27   : > { %462 = vmatpush.msrb.mxu1 %v331_v51  ;;  %404 = vmatpush.msrb.mxu2 %v329_v62  ;;  %v305_v5 = vld [vmem:[#allocation2 + $0x88] sm:$0xff] }
  0x28   : > { %270 = vmatpush.msra.mxu0 %v227_v16  ;;  %520 = vmatpush.msrb.mxu3 %v333_v63  ;;  %v309_v6 = vld [vmem:[#allocation2 + $0xa8] sm:$0xff] }
  0x29   : > { %463 = vmatpush.msrb.mxu1 %v323_v52  ;;  %405 = vmatpush.msrb.mxu2 %v321_v0  ;;  %v297_v7 = vld [vmem:[#allocation2 + $0x48] sm:$0xff] }
  0x2a   : > { %271 = vmatpush.msra.mxu0 %v226_v17  ;;  %521 = vmatpush.msrb.mxu3 %v325_v1  ;;  %v301_v9 = vld [vmem:[#allocation2 + $0x68] sm:$0xff]  ;;  %v335_v17 = vld [vmem:[#allocation2 + $0x178] sm:$0xff] }
  0x2b   : > { %464 = vmatpush.msrb.mxu1 %v315_v53  ;;  %406 = vmatpush.msrb.mxu2 %v313_v2  ;;  %v289_v10 = vld [vmem:[#allocation2 + $0x8] sm:$0xff] }
  0x2c   : > { %272 = vmatpush.msra.mxu0 %v225_v18  ;;  %522 = vmatpush.msrb.mxu3 %v317_v4  ;;  %v293_v13 = vld [vmem:[#allocation2 + $0x28] sm:$0xff] }
  0x2d   : > { %465 = vmatpush.msrb.mxu1 %v307_v54  ;;  %407 = vmatpush.msrb.mxu2 %v305_v5 }
  0x2e   : > { %273 = vmatpush.msra.mxu0 %v224_v23  ;;  %523 = vmatpush.msrb.mxu3 %v309_v6  ;;  %v303_v23 = vld [vmem:[#allocation2 + $0x78] sm:$0xff] }
  0x2f   : > { %466 = vmatpush.msrb.mxu1 %v299_v55  ;;  %408 = vmatpush.msrb.mxu2 %v297_v7 }
  0x30   : > { %274 = vmatpush.msra.mxu0 %v223_v26  ;;  %524 = vmatpush.msrb.mxu3 %v301_v9  ;;  %v348_v26 = vld [vmem:[#allocation2 + $0x1e0] sm:$0xff] }
  0x31   : > { %275 = vmatmul.f32.vlgmr.msra.gmra.mxu0 %v215_v27  ;;  %467 = vmatpush.msrb.mxu1 %v291_v56  ;;  %v295_v27 = vld [vmem:[#allocation2 + $0x38] sm:$0xff] }
  0x32   : > { %547 = vmatpush.msrb.mxu0 %v350_v28  ;;  %409 = vmatpush.msrb.mxu2 %v289_v10  ;;  %v340_v28 = vld [vmem:[#allocation2 + $0x1a0] sm:$0xff] }
  0x33   : > { %525 = vmatpush.msrb.mxu3 %v293_v13 }
  0x34   : > { %548 = vmatpush.msrb.mxu0 %v342_v29  ;;  %v332_v29 = vld [vmem:[#allocation2 + $0x160] sm:$0xff] }
  0x36   : > { %549 = vmatpush.msrb.mxu0 %v334_v30 }
  0x38   : > { %550 = vmatpush.msrb.mxu0 %v326_v36  ;;  %v292_v36 = vld [vmem:[#allocation2 + $0x20] sm:$0xff] }
  0x39   : > { %278 = vmatmul.f32.gmra.mxu0 %v216_v31 }
  0x3a   : > { %551 = vmatpush.msrb.mxu0 %v318_v39 }
  0x3c   : > { %552 = vmatpush.msrb.mxu0 %v310_v42 }
  0x3e   : > { %553 = vmatpush.msrb.mxu0 %v302_v45 }
  0x40   : > { %554 = vmatpush.msrb.mxu0 %v294_v48 }
  0x41   : > { %281 = vmatmul.f32.gmra.mxu0 %v217_v32  ;;  %v324_v32 = vld [vmem:[#allocation2 + $0x120] sm:$0xff] }
  0x49   : > { %284 = vmatmul.f32.gmra.mxu0 %v218_v33  ;;  %v316_v33 = vld [vmem:[#allocation2 + $0xe0] sm:$0xff] }
  0x80   : > { %v252_v58 = vpop.permute.xlu0 %251  ;;  %v257_v3 = vpop.permute.xlu1 %256 }
  0x88   : > { %v242_v8 = vpop.permute.xlu0 %241 }
  0x89   : > { %v247_v16 = vpop.permute.xlu1 %246 }
  0xae   : > { %v276_v11 = vpop.f32.mrf.mxu0 }
  0xaf   : > { %v905_v12 = vadd.f32 %v276_v11, %v242_v8 }
  0xb1   : > { %707 = vmatmul.msk.f32.vlgmr.msra.gmra.mxu1 %vm352_vm0, %v905_v12  ;;  %715 = vmatmul.msk.f32.vlgmr.msra.gmra.mxu3 %vm352_vm0, %v905_v12 }
  0xb2   : > { %731 = vmatmul.msk.f32.vlgmr.msrb.gmra.mxu0 %vm352_vm0, %v905_v12  ;;  %576 = vmatpush.msra.mxu1 %v351_v14 }
  0xb4   : > { %577 = vmatpush.msra.mxu1 %v343_v15 }
  0xb6   : > { %v279_v18 = vpop.f32.mrf.mxu0  ;;  %578 = vmatpush.msra.mxu1 %v335_v17 }
  0xb7   : > { %v280_v19 = vadd.f32 %v279_v18, %v247_v16 }
  0xb8   : > { %579 = vmatpush.msra.mxu1 %v327_v20 }
  0xb9   : > { %708 = vmatmul.msk.f32.gmra.mxu1 %vm352_vm0, %v280_v19  ;;  %716 = vmatmul.msk.f32.gmra.mxu3 %vm352_vm0, %v280_v19 }
  0xba   : > { %732 = vmatmul.msk.f32.gmra.mxu0 %vm352_vm0, %v280_v19  ;;  %580 = vmatpush.msra.mxu1 %v319_v21 }
  0xbc   : > { %581 = vmatpush.msra.mxu1 %v311_v22 }
  0xbe   : > { %v282_v24 = vpop.f32.mrf.mxu0  ;;  %582 = vmatpush.msra.mxu1 %v303_v23 }
  0xbf   : > { %v283_v25 = vadd.f32 %v282_v24, %v252_v58 }
  0xc0   : > { %583 = vmatpush.msra.mxu1 %v295_v27 }
  0xc1   : > { %709 = vmatmul.msk.f32.vlgmr.msra.gmra.mxu2 %vm352_vm0, %v283_v25  ;;  %717 = vmatmul.msk.f32.gmra.mxu3 %vm352_vm0, %v283_v25 }
  0xc2   : > { %719 = vmatmul.msk.f32.vlgmr.msrb.gmra.mxu1 %vm352_vm0, %v905_v12  ;;  %733 = vmatmul.msk.f32.gmra.mxu0 %vm352_vm0, %v283_v25 }
  0xc3   : > { %489 = vmatpush.msra.mxu2 %v348_v26 }
  0xc5   : > { %490 = vmatpush.msra.mxu2 %v340_v28 }
  0xc6   : > { %v285_v30 = vpop.f32.mrf.mxu0 }
  0xc7   : > { %v286_v31 = vadd.f32 %v285_v30, %v257_v3  ;;  %491 = vmatpush.msra.mxu2 %v332_v29 }
  0xc9   : > { %710 = vmatmul.msk.f32.gmra.mxu2 %vm352_vm0, %v286_v31  ;;  %718 = vmatmul.msk.f32.gmra.mxu3 %vm352_vm0, %v286_v31 }
  0xca   : > { %720 = vmatmul.msk.f32.gmra.mxu1 %vm352_vm0, %v280_v19  ;;  %734 = vmatmul.msk.f32.gmra.mxu0 %vm352_vm0, %v286_v31 }
  0xcb   : > { %492 = vmatpush.msra.mxu2 %v324_v32 }
  0xcd   : > { %493 = vmatpush.msra.mxu2 %v316_v33 }
  0xcf   : > { %494 = vmatpush.msra.mxu2 %v308_v34 }
  0xd1   : > { %711 = vmatmul.msk.f32.vlgmr.msrb.gmra.mxu2 %vm352_vm0, %v905_v12  ;;  %727 = vmatmul.msk.f32.vlgmr.msrb.gmra.mxu3 %vm352_vm0, %v905_v12 }
  0xd2   : > { %721 = vmatmul.msk.f32.gmra.mxu1 %vm352_vm0, %v283_v25  ;;  %495 = vmatpush.msra.mxu2 %v300_v35 }
  0xd4   : > { %496 = vmatpush.msra.mxu2 %v292_v36 }
  0xd9   : > { %712 = vmatmul.msk.f32.gmra.mxu2 %vm352_vm0, %v280_v19  ;;  %728 = vmatmul.msk.f32.gmra.mxu3 %vm352_vm0, %v280_v19 }
  0xda   : > { %722 = vmatmul.msk.f32.gmra.mxu1 %vm352_vm0, %v286_v31 }
  0xe1   : > { %713 = vmatmul.msk.f32.gmra.mxu2 %vm352_vm0, %v283_v25  ;;  %729 = vmatmul.msk.f32.gmra.mxu3 %vm352_vm0, %v283_v25 }
  0xe2   : > { %735 = vmatmul.msk.f32.vlgmr.msra.gmra.mxu1 %vm352_vm0, %v905_v12 }
  0xe9   : > { %714 = vmatmul.msk.f32.gmra.mxu2 %vm352_vm0, %v286_v31  ;;  %730 = vmatmul.msk.f32.gmra.mxu3 %vm352_vm0, %v286_v31 }
  0xea   : > { %736 = vmatmul.msk.f32.gmra.mxu1 %vm352_vm0, %v280_v19 }
  0xf1   : > { %723 = vmatmul.msk.f32.vlgmr.msra.gmra.mxu2 %vm352_vm0, %v905_v12 }
  0xf2   : > { %737 = vmatmul.msk.f32.gmra.mxu1 %vm352_vm0, %v283_v25 }
  0xf9   : > { %724 = vmatmul.msk.f32.gmra.mxu2 %vm352_vm0, %v280_v19 }
  0xfa   : > { %738 = vmatmul.msk.f32.gmra.mxu1 %vm352_vm0, %v286_v31 }
 0x101   : > { %725 = vmatmul.msk.f32.gmra.mxu2 %vm352_vm0, %v283_v25 }
 0x109   : > { %726 = vmatmul.msk.f32.gmra.mxu2 %vm352_vm0, %v286_v31 }
 0x12e   : > { %v382_v37 = vpop.f32.mrf.mxu1 }
 0x12f   : > { %597 = vst [vmem:[%s951_s23] sm:$0xff] %v382_v37  ;;  %v556_v38 = vpop.f32.mrf.mxu0 }
 0x130   : > { %603 = vst [vmem:[%s951_s23 + $0x30] sm:$0xff] %v556_v38 }
 0x134   : > { %v440_v39 = vpop.f32.mrf.mxu3 }
 0x135   : > { %599 = vst [vmem:[%s951_s23 + $0x10] sm:$0xff] %v440_v39 }
 0x136   : > { %v385_v40 = vpop.f32.mrf.mxu1 }
 0x137   : > { %605 = vst [vmem:[%s951_s23 + $0x40] sm:$0xff] %v385_v40  ;;  %v559_v41 = vpop.f32.mrf.mxu0 }
 0x138   : > { %611 = vst [vmem:[%s951_s23 + $0x70] sm:$0xff] %v559_v41 }
 0x13c   : > { %v443_v42 = vpop.f32.mrf.mxu3 }
 0x13d   : > { %607 = vst [vmem:[%s951_s23 + $0x50] sm:$0xff] %v443_v42 }
 0x13f   : > { %v469_v43 = vpop.f32.mrf.mxu1  ;;  %v562_v44 = vpop.f32.mrf.mxu0 }
 0x140   : > { %600 = vst [vmem:[%s951_s23 + $0x18] sm:$0xff] %v469_v43 }
 0x141   : > { %619 = vst [vmem:[%s951_s23 + $0xb0] sm:$0xff] %v562_v44 }
 0x144   : > { %v388_v45 = vpop.f32.mrf.mxu2  ;;  %v446_v46 = vpop.f32.mrf.mxu3 }
 0x145   : > { %613 = vst [vmem:[%s951_s23 + $0x80] sm:$0xff] %v388_v45 }
 0x146   : > { %615 = vst [vmem:[%s951_s23 + $0x90] sm:$0xff] %v446_v46 }
 0x147   : > { %v472_v47 = vpop.f32.mrf.mxu1  ;;  %v565_v48 = vpop.f32.mrf.mxu0 }
 0x148   : > { %608 = vst [vmem:[%s951_s23 + $0x58] sm:$0xff] %v472_v47 }
 0x149   : > { %627 = vst [vmem:[%s951_s23 + $0xf0] sm:$0xff] %v565_v48 }
 0x14c   : > { %v391_v49 = vpop.f32.mrf.mxu2  ;;  %v449_v50 = vpop.f32.mrf.mxu3 }
 0x14d   : > { %621 = vst [vmem:[%s951_s23 + $0xc0] sm:$0xff] %v391_v49 }
 0x14e   : > { %623 = vst [vmem:[%s951_s23 + $0xd0] sm:$0xff] %v449_v50 }
 0x14f   : > { %v475_v51 = vpop.f32.mrf.mxu1 }
 0x150   : > { %616 = vst [vmem:[%s951_s23 + $0x98] sm:$0xff] %v475_v51 }
 0x154   : > { %v411_v52 = vpop.f32.mrf.mxu2  ;;  %v527_v53 = vpop.f32.mrf.mxu3 }
 0x155   : > { %598 = vst [vmem:[%s951_s23 + $0x8] sm:$0xff] %v411_v52 }
 0x156   : > { %602 = vst [vmem:[%s951_s23 + $0x28] sm:$0xff] %v527_v53 }
 0x157   : > { %v478_v54 = vpop.f32.mrf.mxu1 }
 0x158   : > { %624 = vst [vmem:[%s951_s23 + $0xd8] sm:$0xff] %v478_v54 }
 0x15c   : > { %v414_v55 = vpop.f32.mrf.mxu2  ;;  %v530_v56 = vpop.f32.mrf.mxu3 }
 0x15d   : > { %606 = vst [vmem:[%s951_s23 + $0x48] sm:$0xff] %v414_v55 }
 0x15e   : > { %610 = vst [vmem:[%s951_s23 + $0x68] sm:$0xff] %v530_v56 }
 0x15f   : > { %v585_v57 = vpop.f32.mrf.mxu1 }
 0x160   : > { %604 = vst [vmem:[%s951_s23 + $0x38] sm:$0xff] %v585_v57 }
 0x164   : > { %v417_v58 = vpop.f32.mrf.mxu2  ;;  %v533_v59 = vpop.f32.mrf.mxu3 }
 0x165   : > { %614 = vst [vmem:[%s951_s23 + $0x88] sm:$0xff] %v417_v58 }
 0x166   : > { %618 = vst [vmem:[%s951_s23 + $0xa8] sm:$0xff] %v533_v59 }
 0x167   : > { %v588_v60 = vpop.f32.mrf.mxu1 }
 0x168   : > { %612 = vst [vmem:[%s951_s23 + $0x78] sm:$0xff] %v588_v60 }
 0x16c   : > { %v420_v61 = vpop.f32.mrf.mxu2  ;;  %v536_v62 = vpop.f32.mrf.mxu3 }
 0x16d   : > { %622 = vst [vmem:[%s951_s23 + $0xc8] sm:$0xff] %v420_v61 }
 0x16e   : > { %626 = vst [vmem:[%s951_s23 + $0xe8] sm:$0xff] %v536_v62 }
 0x16f   : > { %v591_v63 = vpop.f32.mrf.mxu1 }
 0x170   : > { %620 = vst [vmem:[%s951_s23 + $0xb8] sm:$0xff] %v591_v63 }
 0x174   : > { %v498_v0 = vpop.f32.mrf.mxu2 }
 0x175   : > { %601 = vst [vmem:[%s951_s23 + $0x20] sm:$0xff] %v498_v0 }
 0x177   : > { %v594_v1 = vpop.f32.mrf.mxu1 }
 0x178   : > { %628 = vst [vmem:[%s951_s23 + $0xf8] sm:$0xff] %v594_v1 }
 0x17c   : > { %v501_v2 = vpop.f32.mrf.mxu2 }
 0x17d   : > { %609 = vst [vmem:[%s951_s23 + $0x60] sm:$0xff] %v501_v2 }
 0x184   : > { %v504_v3 = vpop.f32.mrf.mxu2 }
 0x185   : > { %617 = vst [vmem:[%s951_s23 + $0xa0] sm:$0xff] %v504_v3 }
 0x18c   : > { %v507_v4 = vpop.f32.mrf.mxu2 }
 0x18d   : > { %625 = vst [vmem:[%s951_s23 + $0xe0] sm:$0xff] %v507_v4 }
 0x18e PF: > { %s15_s15 = sadd.s32 1, %s815_s15  }
 0x18f   : > { %p12_p7 = scmp.ge.s32.totalorder %s15_s15, 4  }
 0x191   :  { %14 = sbr.rel (!%p12_p7) target bundleno = 1 (0x1), region = 71 }
 0x196   :  { %650 = vsyncpa [#allocation3], 1 }
 0x197   :  { %652 = vsyncpa [#allocation3 + $0x1], 1 }

</bundles_post_ra>
